<compile_context>
chip_gen: v6e
topology: v6e:2x2x1
jax: 0.10.0
libtpu: 0.0.40
codegen_flags: <defaults>
</compile_context>

<pallas_src>
import numpy as np
import jax
import jax.numpy as jnp
from jax.experimental import pallas as pl
from jax.experimental.pallas import tpu as pltpu


# ----------------------------------------------------------------------------
# Parameter construction (deterministic, mirrors the PyTorch pos_encoding()).
# ----------------------------------------------------------------------------
def pos_encoding(max_seq_len: int, d_model: int, shift: bool = True) -> jnp.ndarray:
    """Replicates the PyTorch pos_encoding(): base 10**5, full-index exponent,
    sin on even columns, cos on odd columns.  Returns (max_seq_len+shift, d_model)."""
    n_pos = max_seq_len + int(shift)
    pos = np.arange(n_pos, dtype=np.float64)[:, None]            # (n_pos, 1)
    i = np.arange(d_model, dtype=np.float64)[None, :]            # (1, d_model)
    enc = pos / np.power(10 ** 5, 2.0 * i / d_model)             # (n_pos, d_model)
    enc[:, ::2] = np.sin(enc[:, ::2])
    enc[:, 1::2] = np.cos(enc[:, 1::2])
    return jnp.asarray(enc, dtype=jnp.float32)


# ----------------------------------------------------------------------------
# Pallas kernel: broadcast-add positional encoding onto the embeddings.
# Works for both layouts used below:
#   2D lane-dense:  x (tile_b, L*E)  + pe (1, L*E)
#   3D fallback:    x (tile_b, L, E) + pe (1, L, E)
# ----------------------------------------------------------------------------
def _pe_add_kernel(x_ref, pe_ref, o_ref):
    o_ref[...] = x_ref[...] + pe_ref[...]


# Conservative per-call VMEM budget for the pipelined tiles (stays below the
# scoped default on every generation, including v7x's smaller VMEM).
_VMEM_BUDGET_BYTES = 24 * 1024 * 1024


def _choose_row_tile(n_rows: int, bytes_per_row: int) -> int:
    """Largest row tile that (a) divides n_rows, (b) satisfies the sublane
    constraint (multiple of 8, or equal to n_rows), (c) fits the VMEM budget
    accounting for double-buffered input+output tiles plus the resident pe."""
    max_rows_fit = max(1, _VMEM_BUDGET_BYTES // (5 * bytes_per_row))
    if n_rows <= max_rows_fit:
        return n_rows
    best = None
    for t in range(8, min(n_rows, max_rows_fit) + 1, 8):
        if n_rows % t == 0:
            best = t
    # Fallback: take the whole axis (satisfies the layout constraint; only
    # reachable for awkward row counts).
    return best if best is not None else n_rows


def _add_positional_encoding(x: jnp.ndarray, pe: jnp.ndarray) -> jnp.ndarray:
    """x: (B, L, E), pe: (1, L, E) already in x.dtype."""
    B, L, E = x.shape
    LE = L * E
    itemsize = jnp.dtype(x.dtype).itemsize
    cost = pl.CostEstimate(
        flops=B * LE,
        transcendentals=0,
        bytes_accessed=(2 * B * LE + LE) * itemsize,
    )

    if LE % 128 == 0:
        # Lane-dense 2D slab: last dim is a multiple of 128 -> unmasked stores.
        x2 = x.reshape(B, LE)
        pe2 = pe.reshape(1, LE)
        tile_b = _choose_row_tile(B, LE * itemsize)
        grid = (B // tile_b,)
        out2 = pl.pallas_call(
            _pe_add_kernel,
            out_shape=jax.ShapeDtypeStruct((B, LE), x.dtype),
            grid_spec=pltpu.PrefetchScalarGridSpec(
                num_scalar_prefetch=0,
                grid=grid,
                in_specs=[
                    pl.BlockSpec((tile_b, LE), lambda i: (i, 0)),   # x rows
                    pl.BlockSpec((1, LE), lambda i: (0, 0)),        # pe: resident
                ],
                out_specs=pl.BlockSpec((tile_b, LE), lambda i: (i, 0)),
            ),
            compiler_params=pltpu.CompilerParams(
                dimension_semantics=("parallel",)),
            cost_estimate=cost,
        )(x2, pe2)
        return out2.reshape(B, L, E)

    # Fallback: 3D tiling with full (L, E) per block, multiple batch rows per
    # grid step when they fit.  (Lane width is E here; only reachable when
    # L*E is not a multiple of 128.)
    tile_b = _choose_row_tile(B, LE * itemsize)
    grid = (B // tile_b,)
    return pl.pallas_call(
        _pe_add_kernel,
        out_shape=jax.ShapeDtypeStruct((B, L, E), x.dtype),
        grid_spec=pltpu.PrefetchScalarGridSpec(
            num_scalar_prefetch=0,
            grid=grid,
            in_specs=[
                pl.BlockSpec((tile_b, L, E), lambda i: (i, 0, 0)),
                pl.BlockSpec((1, L, E), lambda i: (0, 0, 0)),
            ],
            out_specs=pl.BlockSpec((tile_b, L, E), lambda i: (i, 0, 0)),
        ),
        compiler_params=pltpu.CompilerParams(
            dimension_semantics=("parallel",)),
        cost_estimate=cost,
    )(x, pe)


# ----------------------------------------------------------------------------
# Encoder forward.
# ----------------------------------------------------------------------------
def encoder_forward(x: jnp.ndarray,
                    sequence_mask: jnp.ndarray,
                    positional_encoding: jnp.ndarray,
                    *,
                    max_seq_len: int | None = None,
                    training: bool = True) -> jnp.ndarray:
    """Forward pass of Encoder (positional-encoding add; layers are TODO)."""
    B, L, E = x.shape

    # Glue: attention mask expand, exactly as in the PyTorch forward.
    attention_mask = jnp.broadcast_to(sequence_mask[:, None, :], (B, L, L))
    del attention_mask  # only consumed by B_CoderModule layers (see TODO below)

    # PE table selection mirrors the PyTorch branch: L is static at trace time.
    if (not training) and (max_seq_len is not None) and (L > max_seq_len):
        pe = pos_encoding(L, E)[None, :L, :]
    else:
        pe = positional_encoding[:, :L, :]
    pe = pe.astype(x.dtype)  # keep pe in the activation dtype (no in-kernel cast)

    x = _add_positional_encoding(x, pe)

    # TODO(synk): B_CoderModule (the per-layer encoder block) is not defined in
    # the provided source, so the `for layer in self.layers:` loop is omitted
    # (and the ideal optimization — fusing the PE add into the first layer's
    # QKV projection — cannot be applied).
    return x


# ----------------------------------------------------------------------------
# Pure-JAX reference for correctness checking.
# ----------------------------------------------------------------------------
def encoder_forward_ref(x, sequence_mask, positional_encoding):
    B, L, E = x.shape
    return x + jnp.broadcast_to(positional_encoding[:, :L, :].astype(x.dtype),
                                (B, L, E))


if __name__ == "__main__":
    # Small, module-consistent shapes: batch=2, seq=8, encoder hidden=32.
    model_config = {
        "max_seq_len": 16,
        "transformer": {"encoder": {"hidden": 32, "layers": 2}},
    }
    B, L = 2, 8
    E = model_config["transformer"]["encoder"]["hidden"]

    # nn.Parameter(pos_encoding(...).unsqueeze(0)) -> shape (1, max_seq_len+1, E)
    positional_encoding = pos_encoding(model_config["max_seq_len"], E)[None, :, :]

    key = jax.random.PRNGKey(0)
    kx, _ = jax.random.split(key)
    x = jax.random.normal(kx, (B, L, E), dtype=jnp.float32)
    sequence_mask = jnp.ones((B, L), dtype=jnp.float32)

    out = encoder_forward(x, sequence_mask, positional_encoding,
                          max_seq_len=model_config["max_seq_len"],
                          training=True)
    out = jax.block_until_ready(out)

    ref = encoder_forward_ref(x, sequence_mask, positional_encoding)
    np.testing.assert_allclose(np.asarray(out), np.asarray(ref), rtol=1e-6, atol=1e-6)

    print("KERNEL_OK")
</pallas_src>

<mosaic_0001>
module attributes {stable_mosaic.version = 11 : i64} {
  func.func @_pe_add_kernel(%arg0: i32, %arg1: memref<2x256xf32, #tpu.memory_space<vmem>>, %arg2: memref<1x256xf32, #tpu.memory_space<vmem>>, %arg3: memref<2x256xf32, #tpu.memory_space<vmem>>) attributes {dimension_semantics = [#tpu.dimension_semantics<parallel>], iteration_bounds = array<i64: 1>, scalar_prefetch = 0 : i64, scratch_operands = 0 : i64, tpu.core_type = #tpu.core_type<tc>, window_params = [{transform_indices = @transform_0, window_bounds = array<i64: 2, 256>}, {pipeline_mode = #tpu.pipeline_mode<synchronous>, transform_indices = @transform_1, window_bounds = array<i64: 1, 256>}, {transform_indices = @transform_2, window_bounds = array<i64: 2, 256>}]} {
    %c0 = arith.constant 0 : index
    %c0_0 = arith.constant 0 : index
    %0 = vector.load %arg1[%c0, %c0_0] : memref<2x256xf32, #tpu.memory_space<vmem>>, vector<2x256xf32>
    %c0_1 = arith.constant 0 : index
    %c0_2 = arith.constant 0 : index
    %1 = vector.load %arg2[%c0_1, %c0_2] : memref<1x256xf32, #tpu.memory_space<vmem>>, vector<1x256xf32>
    %2 = vector.broadcast %1 : vector<1x256xf32> to vector<2x256xf32>
    %3 = arith.addf %0, %2 : vector<2x256xf32>
    %c0_3 = arith.constant 0 : index
    %c0_4 = arith.constant 0 : index
    %4 = vector.load %arg3[%c0_3, %c0_4] : memref<2x256xf32, #tpu.memory_space<vmem>>, vector<2x256xf32>
    tpu.vector_store %arg3[%c0_3, %c0_4], %3 {strides = array<i32>} : memref<2x256xf32, #tpu.memory_space<vmem>>, vector<2x256xf32>,
    return
  }
  func.func @transform_0(%arg0: i32) -> (i32, i32) {
    %c0_i32 = arith.constant 0 : i32
    %c0_i32_0 = arith.constant 0 : i32
    return %arg0, %c0_i32 : i32, i32
  }
  func.func @transform_1(%arg0: i32) -> (i32, i32) {
    %c0_i32 = arith.constant 0 : i32
    %c0_i32_0 = arith.constant 0 : i32
    %c0_i32_1 = arith.constant 0 : i32
    return %c0_i32, %c0_i32_0 : i32, i32
  }
  func.func @transform_2(%arg0: i32) -> (i32, i32) {
    %c0_i32 = arith.constant 0 : i32
    %c0_i32_0 = arith.constant 0 : i32
    return %arg0, %c0_i32 : i32, i32
  }
}

</mosaic_0001>

<bundles_post_ra>
// kernel: tpu_custom_call.1
= control target key start
LH: loop header
LB: loop body
LE: loop exit
PB: predicated region body
PF: predicated region fallthrough
CT: control target
= control target key end

     0   :  { %7 = vsyncpa [#allocation3], 0  ;;  %s172_s0 = inlined_call_operand.hbm [shape: f32[2,256], index: 0, kind: input, shape index: {}]   ;;  %s173_s1 = inlined_call_operand.hbm [shape: f32[1,256], index: 1, kind: input, shape index: {}]   ;;  %s174_s2 = inlined_call_operand.hbm [shape: f32[2,256], index: 2, kind: output, shape index: {}]  }
   0x1   :  { %8 = vsyncpa [#allocation6], 0 }
   0x2   :  { %9 = vsyncpa [#allocation4], 0  ;;  %s144_s9 = smov [#allocation2]   ;;  %s145_s11 = smov [#allocation5]  }
   0x3   :  { %s16_s10 = sshll.u32 %s144_s9, 4  ;;  %s26_s12 = sshll.u32 %s145_s11, 4  ;;  %s17_s10 = int_to_ptr.vmem [resolvable:$true] %s16_s10  ;;  %s27_s12 = int_to_ptr.vmem [resolvable:$true] %s26_s12 }
   0x4   :  { %s86_s13 = scalar_lea.vmem %s17_s10, 64  ;;  %p91_p1 = scmp.lt.s32.totalorder %s17_s10, %s17_s10 }
   0x5   :  { %p87_p0 = scmp.ne.s32.totalorder %s17_s10, %s86_s13  ;;  %p92_p2 = scmp.lt.s32.totalorder %s86_s13, %s86_s13 }
   0x7   :  { %p93_p3 = por %p92_p2, %p91_p1 }
   0x9   :  { %p94_p4 = pnand %p93_p3, %p87_p0 }
   0xb   :  { %97 = shalt.err (!%p94_p4)
}
   0xc   :  { %19 = dma.hbm_to_vmem [thread:$0]  %s172_s0, 64, %s17_s10, [#allocation3]  }
   0xd   :  { %s106_s16 = scalar_lea.vmem %s27_s12, 32  ;;  %p111_p6 = scmp.lt.s32.totalorder %s27_s12, %s27_s12 }
   0xe   :  { %p107_p5 = scmp.ne.s32.totalorder %s27_s12, %s106_s16  ;;  %p112_p7 = scmp.lt.s32.totalorder %s106_s16, %s106_s16 }
  0x10   :  { %p113_p8 = por %p112_p7, %p111_p6 }
  0x12   :  { %p114_p9 = pnand %p113_p8, %p107_p5 }
  0x14   :  { %117 = shalt.err (!%p114_p9)
}
  0x15   :  { %29 = dma.hbm_to_vmem [thread:$0]  %s173_s1, 32, %s27_s12, [#allocation6]  }
  0x16   :  { %138 = dma.done.wait [#allocation3], 64  }
  0x17   :  { %139 = vsyncadd [#allocation3], 4294967232 }
  0x18   :  { %140 = dma.done.wait [#allocation6], 32  }
  0x19   :  { %141 = vsyncadd [#allocation6], 4294967264  ;;  %v39_v0 = vlaneseq  ;;  %v146_v1 = vmov 1983009808   ;;  %v37_v7 = vld [vmem:[#allocation5] sm:$0x3] }
  0x1a   :  { %v49_v2 = vunpack.c.l.s4 %v146_v1  ;;  %v36_v12 = vld [vmem:[#allocation2] sm:$0xf]  ;;  %s147_s0 = smov [#allocation7]  }
  0x1b   :  { %v40_v3 = vshrl.u32 %v39_v0, 7  ;;  %s64_s19 = sshll.u32 %s147_s0, 4  ;;  %s65_s19 = int_to_ptr.vmem [resolvable:$true] %s64_s19 }
  0x1c   :  { %v50_v6 = vunpack.c.0.s8 %v49_v2  ;;  %s118_s1 = scalar_lea.vmem %s65_s19, 64  ;;  %p123_p11 = scmp.lt.s32.totalorder %s65_s19, %s65_s19 }
  0x1d   :  { %v41_v4 = vsub.s32 0, %v40_v3  ;;  %v45_v5 = vsub.s32 1, %v40_v3  ;;  %p119_p10 = scmp.ne.s32.totalorder %s65_s19, %s118_s1  ;;  %p124_p12 = scmp.lt.s32.totalorder %s118_s1, %s118_s1 }
  0x1e   :  { %v53_v10 = vsub.s32 %v50_v6, %v40_v3 }
  0x1f   :  { %v42_v8 = vrot.slane %v37_v7, %v41_v4  ;;  %v46_v9 = vrot.slane %v37_v7, %v45_v5  ;;  %p125_p13 = por %p124_p12, %p123_p11 }
  0x21   :  { %v47_v11 = vcombine.low %v42_v8, %v46_v9  ;;  %p126_p0 = pnand %p125_p13, %p119_p10 }
  0x23   :  { %v54_v13 = vrot.slane %v47_v11, %v53_v10 }
  0x25   :  { %v56_v14 = vadd.f32 %v54_v13, %v36_v12 }
  0x27   :  { %57 = vst [vmem:[#allocation7] sm:$0xf] %v56_v14 }
  0x28   :  { %129 = shalt.err (!%p126_p0)
}
  0x29   :  { %67 = dma.vmem_to_hbm [thread:$0]  %s65_s19, 64, %s174_s2, [#allocation4]  }
  0x2a   :  { %142 = dma.done.wait [#allocation4], 64  }
  0x2b   :  { %143 = vsyncadd [#allocation4], 4294967232 }
  0x2c   :  { %71 = vsyncpa [#allocation3], 1 }
  0x2d   :  { %72 = vsyncpa [#allocation6], 1 }
  0x2e   :  { %73 = vsyncpa [#allocation4], 1 }

</bundles_post_ra>
